<compile_context>
chip_gen: v7x
topology: tpu7x:2x2x1
jax: 0.10.0
libtpu: 0.0.40
codegen_flags: <defaults>
</compile_context>

<pallas_src>
import jax
import jax.numpy as jnp
import numpy as np
from jax.experimental import pallas as pl
from jax.experimental.pallas import tpu as pltpu


def ffn_kernel(x_ref, w1_ref, b1_ref, w2_ref, b2_ref, o_ref):
    # x_ref:  (tm, dim)      bf16 tile of tokens
    # w1_ref: (dim, hidden)  bf16 full weight (VMEM-resident, constant index_map)
    # b1_ref: (1, hidden)    f32
    # w2_ref: (hidden, dim)  bf16 full weight
    # b2_ref: (1, dim)       f32
    # o_ref:  (tm, dim)      f32
    x = x_ref[...]
    # fc1: bf16 x bf16 -> f32 accumulate on the MXU.
    h = jnp.dot(x, w1_ref[...], preferred_element_type=jnp.float32)
    h = h + b1_ref[...]                       # f32 bias (VPU)
    h = jnp.where(h >= 0, h, 0.01 * h)        # LeakyReLU(0.01) in f32 (VPU)
    # fc2: cast activation back to bf16 for the MXU, accumulate in f32.
    y = jnp.dot(h.astype(w2_ref.dtype), w2_ref[...],
                preferred_element_type=jnp.float32)
    y = y + b2_ref[...]
    o_ref[...] = y.astype(o_ref.dtype)


def _round_up(a, b):
    return ((a + b - 1) // b) * b


def ffn_pallas(x, w1, b1, w2, b2, *, tm=256, compute_dtype=jnp.bfloat16):
    """x: (N, dim) f32.  w1: (dim, hidden), b1: (hidden,), w2: (hidden, dim),
    b2: (dim,) — all f32 (PyTorch params, transposed).  Returns (N, dim) f32."""
    N, dim = x.shape
    hidden = w1.shape[1]

    # Row tile: multiple of 16 (covers f32 8-sublane and bf16 16-sublane tiling),
    # never needlessly larger than the (rounded-up) row count.
    tm = _round_up(min(tm, _round_up(N, 16)), 16)

    # Cast matmul operands to bf16 once in the wrapper (halves weight VMEM and
    # x-tile HBM traffic); biases stay f32 and are added in-kernel.
    x_c = x.astype(compute_dtype)
    w1_c = w1.astype(compute_dtype)
    w2_c = w2.astype(compute_dtype)
    b1_2d = b1.reshape(1, hidden).astype(jnp.float32)
    b2_2d = b2.reshape(1, dim).astype(jnp.float32)

    grid = (pl.cdiv(N, tm),)

    c_item = np.dtype(compute_dtype).itemsize
    cost = pl.CostEstimate(
        flops=4 * N * dim * hidden,                     # two (N,dim)x(dim,hidden)-class matmuls
        transcendentals=0,
        bytes_accessed=(N * dim * c_item                # x (bf16 in)
                        + dim * hidden * c_item         # w1
                        + hidden * dim * c_item         # w2
                        + hidden * 4 + dim * 4          # biases
                        + N * dim * 4),                 # out (f32)
    )

    return pl.pallas_call(
        ffn_kernel,
        out_shape=jax.ShapeDtypeStruct((N, dim), jnp.float32),
        grid_spec=pltpu.PrefetchScalarGridSpec(
            num_scalar_prefetch=0,
            grid=grid,
            in_specs=[
                pl.BlockSpec((tm, dim), lambda i: (i, 0)),       # x row tile
                pl.BlockSpec((dim, hidden), lambda i: (0, 0)),   # w1 (full, resident)
                pl.BlockSpec((1, hidden), lambda i: (0, 0)),     # b1
                pl.BlockSpec((hidden, dim), lambda i: (0, 0)),   # w2 (full, resident)
                pl.BlockSpec((1, dim), lambda i: (0, 0)),        # b2
            ],
            out_specs=pl.BlockSpec((tm, dim), lambda i: (i, 0)),
        ),
        compiler_params=pltpu.CompilerParams(
            dimension_semantics=("parallel",)),
        cost_estimate=cost,
    )(x_c, w1_c, b1_2d, w2_c, b2_2d)


def ffn_reference(x, w1, b1, w2, b2, compute_dtype=jnp.bfloat16):
    """Pure-JAX reference mimicking the kernel's bf16-matmul / f32-accumulate path."""
    xc = x.astype(compute_dtype)
    h = jnp.dot(xc, w1.astype(compute_dtype),
                preferred_element_type=jnp.float32) + b1
    h = jnp.where(h >= 0, h, 0.01 * h)
    y = jnp.dot(h.astype(compute_dtype), w2.astype(compute_dtype),
                preferred_element_type=jnp.float32) + b2
    return y


if __name__ == "__main__":
    # Small shapes consistent with the module; feature dims are 128-multiples
    # so loads/stores are lane-dense.
    batch, seq, dim, hidden = 2, 256, 128, 256

    key = jax.random.PRNGKey(0)
    kx, kw1, kb1, kw2, kb2 = jax.random.split(key, 5)

    x = jax.random.normal(kx, (batch, seq, dim), dtype=jnp.float32)

    # PyTorch shapes: fc1.weight (hidden, dim), fc2.weight (dim, hidden);
    # stored transposed here for row-major matmul.
    w1 = jax.random.normal(kw1, (dim, hidden), dtype=jnp.float32) * 0.05
    b1 = jax.random.normal(kb1, (hidden,), dtype=jnp.float32) * 0.05
    w2 = jax.random.normal(kw2, (hidden, dim), dtype=jnp.float32) * 0.05
    b2 = jax.random.normal(kb2, (dim,), dtype=jnp.float32) * 0.05

    # --- Case 1: N divisible by the row tile (grid of 2 steps -> both v7x TCs busy).
    x_flat = x.reshape(batch * seq, dim)                 # N = 512
    out_flat = ffn_pallas(x_flat, w1, b1, w2, b2, tm=256)
    out = out_flat.reshape(batch, seq, dim)
    jax.block_until_ready(out)

    ref = ffn_reference(x_flat, w1, b1, w2, b2).reshape(batch, seq, dim)
    assert jnp.allclose(out, ref, atol=1e-3, rtol=1e-3), "mismatch vs reference (N=512)"

    # Sanity vs. pure-f32 math (bf16 matmul rounding only).
    ref_f32 = (x_flat @ w1 + b1)
    ref_f32 = jnp.where(ref_f32 >= 0, ref_f32, 0.01 * ref_f32) @ w2 + b2
    assert jnp.allclose(out_flat, ref_f32, atol=5e-2, rtol=5e-2), "bf16 drift too large"

    # --- Case 2: N NOT divisible by the row tile (partial final block, masked writes).
    x_rag = x_flat[:320]                                 # N = 320, tm = 256 -> 2 blocks
    out_rag = ffn_pallas(x_rag, w1, b1, w2, b2, tm=256)
    jax.block_until_ready(out_rag)
    ref_rag = ffn_reference(x_rag, w1, b1, w2, b2)
    assert jnp.allclose(out_rag, ref_rag, atol=1e-3, rtol=1e-3), "mismatch vs reference (N=320)"

    print("KERNEL_OK")
</pallas_src>

<mosaic_0001>
module attributes {stable_mosaic.version = 11 : i64} {
  func.func @ffn_kernel(%arg0: i32, %arg1: memref<256x128xbf16, #tpu.memory_space<vmem>>, %arg2: memref<128x256xbf16, #tpu.memory_space<vmem>>, %arg3: memref<1x256xf32, #tpu.memory_space<vmem>>, %arg4: memref<256x128xbf16, #tpu.memory_space<vmem>>, %arg5: memref<1x128xf32, #tpu.memory_space<vmem>>, %arg6: memref<256x128xf32, #tpu.memory_space<vmem>>) attributes {dimension_semantics = [#tpu.dimension_semantics<parallel>], iteration_bounds = array<i64: 2>, scalar_prefetch = 0 : i64, scratch_operands = 0 : i64, tpu.core_type = #tpu.core_type<tc>, window_params = [{transform_indices = @transform_0, window_bounds = array<i64: 256, 128>}, {pipeline_mode = #tpu.pipeline_mode<synchronous>, transform_indices = @transform_1, window_bounds = array<i64: 128, 256>}, {pipeline_mode = #tpu.pipeline_mode<synchronous>, transform_indices = @transform_2, window_bounds = array<i64: 1, 256>}, {pipeline_mode = #tpu.pipeline_mode<synchronous>, transform_indices = @transform_3, window_bounds = array<i64: 256, 128>}, {pipeline_mode = #tpu.pipeline_mode<synchronous>, transform_indices = @transform_4, window_bounds = array<i64: 1, 128>}, {transform_indices = @transform_5, window_bounds = array<i64: 256, 128>}]} {
    %c0 = arith.constant 0 : index
    %c0_0 = arith.constant 0 : index
    %0 = vector.load %arg1[%c0, %c0_0] : memref<256x128xbf16, #tpu.memory_space<vmem>>, vector<256x128xbf16>
    %c0_1 = arith.constant 0 : index
    %c0_2 = arith.constant 0 : index
    %1 = vector.load %arg2[%c0_1, %c0_2] : memref<128x256xbf16, #tpu.memory_space<vmem>>, vector<128x256xbf16>
    %cst = arith.constant dense<0.000000e+00> : vector<256x256xf32>
    %2 = tpu.matmul %0, %1, %cst {dimension_numbers = #tpu.dot_dimension_numbers<[1], [0], [0], [1], [0, 0, 1, 1], [], []>} : vector<256x128xbf16>, vector<128x256xbf16>, vector<256x256xf32> -> vector<256x256xf32>
    %c0_3 = arith.constant 0 : index
    %c0_4 = arith.constant 0 : index
    %3 = vector.load %arg3[%c0_3, %c0_4] : memref<1x256xf32, #tpu.memory_space<vmem>>, vector<1x256xf32>
    %4 = vector.broadcast %3 : vector<1x256xf32> to vector<256x256xf32>
    %5 = arith.addf %2, %4 : vector<256x256xf32>
    %cst_5 = arith.constant 0.000000e+00 : f32
    %6 = vector.broadcast %cst_5 : f32 to vector<256x256xf32>
    %7 = arith.cmpf oge, %5, %6 : vector<256x256xf32>
    %cst_6 = arith.constant 0.00999999977 : f32
    %8 = vector.broadcast %cst_6 : f32 to vector<256x256xf32>
    %9 = arith.mulf %8, %5 : vector<256x256xf32>
    %10 = arith.select %7, %5, %9 : vector<256x256xi1>, vector<256x256xf32>
    %11 = arith.truncf %10 : vector<256x256xf32> to vector<256x256xbf16>
    %c0_7 = arith.constant 0 : index
    %c0_8 = arith.constant 0 : index
    %12 = vector.load %arg4[%c0_7, %c0_8] : memref<256x128xbf16, #tpu.memory_space<vmem>>, vector<256x128xbf16>
    %cst_9 = arith.constant dense<0.000000e+00> : vector<256x128xf32>
    %13 = tpu.matmul %11, %12, %cst_9 {dimension_numbers = #tpu.dot_dimension_numbers<[1], [0], [0], [1], [0, 0, 1, 1], [], []>} : vector<256x256xbf16>, vector<256x128xbf16>, vector<256x128xf32> -> vector<256x128xf32>
    %c0_10 = arith.constant 0 : index
    %c0_11 = arith.constant 0 : index
    %14 = vector.load %arg5[%c0_10, %c0_11] : memref<1x128xf32, #tpu.memory_space<vmem>>, vector<1x128xf32>
    %15 = vector.broadcast %14 : vector<1x128xf32> to vector<256x128xf32>
    %16 = arith.addf %13, %15 : vector<256x128xf32>
    %c0_12 = arith.constant 0 : index
    %c0_13 = arith.constant 0 : index
    %17 = vector.load %arg6[%c0_12, %c0_13] : memref<256x128xf32, #tpu.memory_space<vmem>>, vector<256x128xf32>
    tpu.vector_store %arg6[%c0_12, %c0_13], %16 {strides = array<i32>} : memref<256x128xf32, #tpu.memory_space<vmem>>, vector<256x128xf32>,
    return
  }
  func.func @transform_0(%arg0: i32) -> (i32, i32) {
    %c0_i32 = arith.constant 0 : i32
    %c0_i32_0 = arith.constant 0 : i32
    return %arg0, %c0_i32 : i32, i32
  }
  func.func @transform_1(%arg0: i32) -> (i32, i32) {
    %c0_i32 = arith.constant 0 : i32
    %c0_i32_0 = arith.constant 0 : i32
    %c0_i32_1 = arith.constant 0 : i32
    return %c0_i32, %c0_i32_0 : i32, i32
  }
  func.func @transform_2(%arg0: i32) -> (i32, i32) {
    %c0_i32 = arith.constant 0 : i32
    %c0_i32_0 = arith.constant 0 : i32
    %c0_i32_1 = arith.constant 0 : i32
    return %c0_i32, %c0_i32_0 : i32, i32
  }
  func.func @transform_3(%arg0: i32) -> (i32, i32) {
    %c0_i32 = arith.constant 0 : i32
    %c0_i32_0 = arith.constant 0 : i32
    %c0_i32_1 = arith.constant 0 : i32
    return %c0_i32, %c0_i32_0 : i32, i32
  }
  func.func @transform_4(%arg0: i32) -> (i32, i32) {
    %c0_i32 = arith.constant 0 : i32
    %c0_i32_0 = arith.constant 0 : i32
    %c0_i32_1 = arith.constant 0 : i32
    return %c0_i32, %c0_i32_0 : i32, i32
  }
  func.func @transform_5(%arg0: i32) -> (i32, i32) {
    %c0_i32 = arith.constant 0 : i32
    %c0_i32_0 = arith.constant 0 : i32
    return %arg0, %c0_i32 : i32, i32
  }
}

</mosaic_0001>

<bundles_post_ra>
// kernel: tpu_custom_call.1
= control target key start
LH: loop header
LB: loop body
LE: loop exit
PB: predicated region body
PF: predicated region fallthrough
CT: control target
= control target key end

     0   :  { %10 = vsyncpa [#allocation3], 0  ;;  %s2290_s0 = inlined_call_operand.hbm [shape: bf16[512,128], index: 0, kind: input, shape index: {}]   ;;  %s2291_s1 = inlined_call_operand.hbm [shape: bf16[128,256], index: 1, kind: input, shape index: {}]   ;;  %s2292_s2 = inlined_call_operand.vmem [shape: f32[1,256], index: 2, kind: input, shape index: {}]   ;;  %s2293_s3 = inlined_call_operand.hbm [shape: bf16[256,128], index: 3, kind: input, shape index: {}]   ;;  %s2294_s4 = inlined_call_operand.vmem [shape: f32[1,128], index: 4, kind: input, shape index: {}]   ;;  %s2295_s5 = inlined_call_operand.hbm [shape: f32[512,128], index: 5, kind: output, shape index: {}]  }
   0x1   :  { %12 = vsyncpa [#allocation3 + $0x1], 0 }
   0x2   :  { %13 = vsyncpa [#allocation6], 0 }
   0x3   :  { %14 = vsyncpa [#allocation4], 0 }
   0x4   :  { %16 = vsyncpa [#allocation4 + $0x1], 0  ;;  %s1872_s18 = smov 0   ;;  %s1874_s19 = smov 0  }
   0x5   :  { %s1876_s20 = smov 0   ;;  %s1878_s21 = smov 0  }
   0x6 LB: > { %s1893_s22 = sadd.s32 4294967295, %s1829_s21   ;;  %s1362_s23 = sadd.s32 4294967294, %s1829_s21   ;;  %s1829_s21 = sphi %s1878_s21, %s2315_s21   ;;  %s1825_s20 = sphi %s1876_s20, %s2314_s20   ;;  %s1821_s19 = sphi %s1874_s19, %s2313_s19   ;;  %s1817_s18 = sphi %s1872_s18, %s2312_s18  }
   0x7   : > { %p42_p0 = scmp.ne.s32.totalorder %s1821_s19, %s1817_s18  ;;  %p2296_p1 = scmp.eq.s32.totalorder %s1893_s22, 0 }
   0x8   : > { %p156_p3 = scmp.eq.s32.totalorder %s1362_s23, 1  ;;  %p1363_p5 = scmp.ge.s32.totalorder %s1829_s21, 1 }
   0x9   : > { %p1902_p4 = por %p2296_p1, %p42_p0  ;;  %p163_p7 = scmp.lt.s32.totalorder %s1829_s21, 3 }
   0xa   : > { %p1907_p6 = por %p156_p3, %p42_p0  ;;  %s1831_s27 = smov [#allocation5]  }
   0xb   : > { %s2299_s24 = scalar_select %p1902_p4, 1, 0 }
   0xc   : > { %s2300_s25 = scalar_select %p1907_p6, 1, 0 }
   0xd   : > { %p1912_p8 = pnand %p1363_p5, %p163_p7  ;;  %s175_s28 = sshll.u32 %s1831_s27, 4  ;;  %s1916_s28 = int_to_ptr.vmem [resolvable:$true] %s175_s28 }
   0xe   : > { %s1832_s30 = smov [#allocation7]   ;;  %s1673_s9 = scalar_lea.hbm %s2291_s1, 2048 }
   0xf   : > { %p1555_p9 = pneg %p1912_p8  ;;  %s191_s6 = sshll.u32 %s1832_s30, 4  ;;  %s1927_s6 = int_to_ptr.vmem [resolvable:$true] %s191_s6 }
  0x10   : > { %p1674_p12 = scmp.ne.s32.totalorder %s2291_s1, %s1673_s9  ;;  %p1680_p5 = scmp.lt.u32.totalorder %s1673_s9, %s2291_s1 }
  0x11   : > { %p1923_p11 = pnand %p1555_p9, %p2296_p1 }
  0x13   : > { %p1675_p13 = pneg %p1923_p11 }
  0x15   : > { %p1676_p0 = pnand %p1675_p13, %p1674_p12 }
  0x17   : > { %p1677_p3 = pneg %p1676_p0 }
  0x19   : > { %p1682_p7 = pnand %p1680_p5, %p1677_p3 }
  0x1b   : > { %1685 = shalt.err (!%p1682_p7)
}
  0x1c   : > { %s1686_s14 = scalar_lea.vmem %s1916_s28, 2048  ;;  %p1694_p2 = scmp.lt.s32.totalorder %s1916_s28, %s1916_s28 }
  0x1d   : > { %p1687_p9 = scmp.ne.s32.totalorder %s1916_s28, %s1686_s14  ;;  %p1695_p12 = scmp.lt.s32.totalorder %s1686_s14, %s1686_s14 }
  0x1f   : > { %p1689_p10 = pnand %p1687_p9, %p1675_p13  ;;  %p1696_p0 = por %p1695_p12, %p1694_p2 }
  0x21   : > { %p1690_p1 = pneg %p1689_p10 }
  0x23   : > { %p1697_p6 = pnand %p1696_p0, %p1690_p1 }
  0x25   : > { %1700 = shalt.err (!%p1697_p6)
}
  0x26   : > { %s1833_s15 = smov 128   ;;  %s1834_s16 = smov 8  }
  0x27   : > { %1558 = dma.hbm_to_vmem [thread:$0]  (!%p1923_p11), %s2291_s1, 2048, %s1916_s28, [#allocation6], %s1833_s15, %s1833_s15, %s1834_s16  }
  0x28   : > { %s1701_s7 = scalar_lea.hbm %s2293_s3, 2048 }
  0x29   : > { %p1702_p2 = scmp.ne.s32.totalorder %s2293_s3, %s1701_s7  ;;  %p1708_p10 = scmp.lt.u32.totalorder %s1701_s7, %s2293_s3 }
  0x2b   : > { %p1704_p1 = pnand %p1702_p2, %p1675_p13 }
  0x2d   : > { %p1705_p6 = pneg %p1704_p1 }
  0x2f   : > { %p1710_p3 = pnand %p1708_p10, %p1705_p6 }
  0x31   : > { %1713 = shalt.err (!%p1710_p3)
}
  0x32   : > { %s1714_s28 = scalar_lea.vmem %s1927_s6, 2048  ;;  %p1722_p12 = scmp.lt.s32.totalorder %s1927_s6, %s1927_s6 }
  0x33   : > { %p1715_p5 = scmp.ne.s32.totalorder %s1927_s6, %s1714_s28  ;;  %p1723_p0 = scmp.lt.s32.totalorder %s1714_s28, %s1714_s28 }
  0x35   : > { %p1717_p7 = pnand %p1715_p5, %p1675_p13  ;;  %p1724_p2 = por %p1723_p0, %p1722_p12 }
  0x37   : > { %p1718_p9 = pneg %p1717_p7 }
  0x39   : > { %p1725_p1 = pnand %p1724_p2, %p1718_p9 }
  0x3b   : > { %1728 = shalt.err (!%p1725_p1)
}
  0x3c   : > { %s1835_s12 = smov 64   ;;  %s1836_s13 = smov 4  }
  0x3d   : > { %1561 = dma.hbm_to_vmem [thread:$0]  (!%p1923_p11), %s2293_s3, 2048, %s1927_s6, [#allocation6], %s1835_s12, %s1835_s12, %s1836_s13  }
  0x3e   : > { %s1985_s16 = sadd.s32 1, %s1829_s21   ;;  %s29_s23 = sadd.s32 1, %s1825_s20 }
  0x3f   : > { %s26_s17 = ssub.s32 %s1829_s21, %s1985_s16  ;;  %p36_p6 = scmp.ne.s32.totalorder %s1825_s20, %s1821_s19 }
  0x40   : > { %p27_p13 = scmp.eq.s32.totalorder %s26_s17, 0  ;;  %p37_p10 = scmp.eq.s32.totalorder %s1829_s21, 0 }
  0x41   : > { %p2303_p5 = scmp.eq.s32.totalorder %s1893_s22, 1  ;;  %p1572_p9 = scmp.lt.s32.totalorder %s1829_s21, 2 }
  0x42   : > { %s1994_s27 = scalar_select %p27_p13, %s1825_s20, %s29_s23  }
  0x43   : > { %p38_p3 = por %p37_p10, %p36_p6  ;;  %p1998_p7 = por %p2303_p5, %p36_p6 }
  0x44   : > { %s208_s30 = sand.u32 1, %s1825_s20   ;;  %s1429_s6 = sshll.u32 %s1829_s21, 11 }
  0x45   : > { %s2304_s29 = scalar_select %p1998_p7, 1, 0 }
  0x46   : > { %s1367_s7 = sshll.u32 %s208_s30, 7  ;;  %s2008_s10 = scalar_lea.hbm %s2290_s0, %s1429_s6 }
  0x47   : > { %s212_s11 = scalar_lea.vmem [#allocation2], %s1367_s7  ;;  %p2012_p11 = pnand %p1572_p9, %p38_p3 }
  0x48   : > { %s219_s28 = sshll.u32 %s212_s11, 4  ;;  %s2016_s15 = scalar_lea.sflag [#allocation3], %s208_s30  ;;  %s2010_s28 = int_to_ptr.vmem [resolvable:$true] %s219_s28 }
  0x49   : > { %s1729_s17 = scalar_lea.hbm %s2008_s10, 2048  ;;  %p1731_p0 = pneg %p2012_p11 }
  0x4a   : > { %p1730_p12 = scmp.ne.s32.totalorder %s2008_s10, %s1729_s17  ;;  %s1734_s6 = scalar_lea.hbm %s2290_s0, 4096 }
  0x4b   : > { %p1735_p13 = scmp.lt.u32.totalorder %s2008_s10, %s2290_s0  ;;  %p1736_p6 = scmp.lt.u32.totalorder %s1734_s6, %s1729_s17 }
  0x4c   : > { %p1732_p2 = pnand %p1731_p0, %p1730_p12  ;;  %p1738_p3 = scmp.lt.u32.totalorder %s1729_s17, %s2008_s10 }
  0x4d   : > { %p1737_p10 = por %p1736_p6, %p1735_p13 }
  0x4e   : > { %p1733_p1 = pneg %p1732_p2 }
  0x4f   : > { %p1739_p5 = por %p1738_p3, %p1737_p10 }
  0x51   : > { %p1740_p9 = pnand %p1739_p5, %p1733_p1 }
  0x53   : > { %1743 = shalt.err (!%p1740_p9)
}
  0x54   : > { %s1744_s30 = scalar_lea.vmem %s2010_s28, 2048  ;;  %s1837_s11 = smov [#allocation2]  }
  0x55   : > { %p1745_p12 = scmp.ne.s32.totalorder %s2010_s28, %s1744_s30  ;;  %s1749_s23 = sshll.u32 %s1837_s11, 4  ;;  %s1750_s23 = int_to_ptr.vmem [resolvable:$false] %s1749_s23 }
  0x56   : > { %s1751_s7 = scalar_lea.vmem %s1750_s23, 4096  ;;  %p1752_p4 = scmp.lt.s32.totalorder %s2010_s28, %s1750_s23 }
  0x57   : > { %p1747_p2 = pnand %p1745_p12, %p1731_p0  ;;  %p1753_p13 = scmp.lt.s32.totalorder %s1751_s7, %s1744_s30 }
  0x59   : > { %p1748_p7 = pneg %p1747_p2  ;;  %p1754_p6 = por %p1753_p13, %p1752_p4 }
  0x5b   : > { %p1755_p10 = pnand %p1754_p6, %p1748_p7 }
  0x5d   : > { %1758 = shalt.err (!%p1755_p10)
}
  0x5e   : > { %1565 = dma.hbm_to_vmem [thread:$0]  (!%p2012_p11), %s2008_s10, 2048, %s2010_s28, %s2016_s15, %s1835_s12, %s1835_s12, %s1836_s13  }
  0x5f   : > { %231 = sbr.rel (%p1912_p8) target bundleno = 716 (0x2cc), region = 40  ;;  %s2050_s17 = sand.u32 (!%p1912_p8), 1, %s1821_s19  }
  0x60   : > { %s1371_s6 = sshll.u32 (!%p1912_p8), %s2050_s17, 7  ;;  %s234_s8 = scalar_lea.sflag (!%p1912_p8), [#allocation3], %s2050_s17 }
  0x61   : > { %s2054_s9 = scalar_lea.vmem (!%p1912_p8), [#allocation2], %s1371_s6  ;;  %p2306_p4 = scmp.ne.s32.totalorder (!%p1912_p8), %s2299_s24, 0 }
  0x66   : > { %1804 = dma.done.wait (%p2306_p4), %s234_s8, 2048  }
  0x67   : > { %1806 = vsyncadd (%p2306_p4), %s234_s8, 4294965248  ;;  %p2307_p7 = scmp.eq.s32.totalorder %s1893_s22, 0 }
  0x69   : > { %1808 = dma.done.wait (%p2307_p7), [#allocation6], 4096   ;;  %p2308_p8 = pmov %p2307_p7 }
  0x6a   : > { %v1838_v0 = vmov 0   ;;  %v1617_v1 = vld [vmem:[#allocation5 + $0x4] ss:$8 sps:$4 sm:$0xff]   ;;  %v1619_v2 = vld [vmem:[#allocation5] ss:$8 sps:$4 sm:$0xff]   ;;  %v1661_v22 = vld [vmem:[#allocation7 + $0x50] sm:$0xff]   ;;  %v325_v49 = vlaneseq }
  0x6b   : > { %1810 = vsyncadd (%p2308_p8), [#allocation6], 4294963200  ;;  %543 = vmatprep.mubr.bf16.mxu0 %v1838_v0  ;;  %511 = vmatprep.subr.bf16.mxu0 %v1617_v1  ;;  %v1620_v3 = vld [vmem:[#allocation5 + $0x14] ss:$8 sps:$4 sm:$0xff]   ;;  %v1622_v4 = vld [vmem:[#allocation5 + $0x10] ss:$8 sps:$4 sm:$0xff]  }
  0x6c   : > { %512 = vmatpush1.bf16.msra.mxu0 %v1619_v2  ;;  %v1623_v5 = vld [vmem:[#allocation5 + $0x24] ss:$8 sps:$4 sm:$0xff]   ;;  %v1625_v6 = vld [vmem:[#allocation5 + $0x20] ss:$8 sps:$4 sm:$0xff]   ;;  %v1626_v7 = vld [vmem:[#allocation5 + $0x34] ss:$8 sps:$4 sm:$0xff]  }
  0x6d   : > { %513 = vmatprep.subr.bf16.mxu0 %v1620_v3  ;;  %v1628_v8 = vld [vmem:[#allocation5 + $0x30] ss:$8 sps:$4 sm:$0xff]   ;;  %v1629_v9 = vld [vmem:[#allocation5 + $0x44] ss:$8 sps:$4 sm:$0xff]   ;;  %v1631_v10 = vld [vmem:[#allocation5 + $0x40] ss:$8 sps:$4 sm:$0xff]  }
  0x6e   : > { %v1632_v11 = vld [vmem:[#allocation5 + $0x54] ss:$8 sps:$4 sm:$0xff]   ;;  %v1634_v12 = vld [vmem:[#allocation5 + $0x50] ss:$8 sps:$4 sm:$0xff]   ;;  %v1635_v13 = vld [vmem:[#allocation5 + $0x64] ss:$8 sps:$4 sm:$0xff]  }
  0x6f   : > { %v1637_v14 = vld [vmem:[#allocation5 + $0x60] ss:$8 sps:$4 sm:$0xff]   ;;  %v1638_v15 = vld [vmem:[#allocation5 + $0x74] ss:$8 sps:$4 sm:$0xff]   ;;  %v1640_v16 = vld [vmem:[#allocation5 + $0x70] ss:$8 sps:$4 sm:$0xff]  }
  0x70   : > { %514 = vmatpush1.bf16.msra.mxu0 %v1622_v4  ;;  %v1657_v17 = vld [vmem:[#allocation7 + $0x40] sm:$0xff]   ;;  %v1659_v20 = vld [vmem:[#allocation7 + $0x48] sm:$0xff]   ;;  %v1662_v23 = vld [vmem:[#allocation7 + $0x10] sm:$0xff]   ;;  %v326_v50 = vshrl.u32 %v325_v49, 7  ;;  %s1374_s12 = sshll.u32 %s2050_s17, 8  ;;  %s1430_s14 = sshll.u32 %s1893_s22, 12 }
  0x71   : > { %515 = vmatprep.subr.bf16.mxu0 %v1623_v5  ;;  %v1641_v18 = vld [vmem:[%s2054_s9] sm:$0xff]   ;;  %1431 = vmatprep.subr.bf16.mxu1 %v1657_v17  ;;  %v1660_v21 = vld [vmem:[#allocation7 + $0x8] sm:$0xff]   ;;  %v1663_v24 = vld [vmem:[#allocation7 + $0x58] sm:$0xff]   ;;  %s2174_s28 = scalar_lea.vmem [#allocation8], %s1374_s12  ;;  %s2241_s23 = scalar_lea.hbm %s2295_s5, %s1430_s14 }
  0x72   : > { %v1658_v19 = vld [vmem:[#allocation7] sm:$0xff]   ;;  %v1642_v25 = vld [vmem:[%s2054_s9 + $0x8] sm:$0xff]   ;;  %v1664_v26 = vld [vmem:[#allocation7 + $0x18] sm:$0xff]   ;;  %v327_v51 = vsub.s32 0, %v326_v50  ;;  %v331_v53 = vsub.s32 1, %v326_v50  ;;  %s1270_s15 = sshll.u32 %s2174_s28, 4  ;;  %s2243_s15 = int_to_ptr.vmem [resolvable:$true] %s1270_s15 }
  0x73   : > { %1432 = vmatpush3.bf16.msra.mxu1 %v1658_v19  ;;  %v1665_v27 = vld [vmem:[#allocation7 + $0x60] sm:$0xff]   ;;  %v1643_v29 = vld [vmem:[%s2054_s9 + $0x10] sm:$0xff]   ;;  %v1644_v30 = vld [vmem:[%s2054_s9 + $0x18] sm:$0xff]   ;;  %s1257_s22 = scalar_lea.sflag [#allocation4], %s2050_s17  ;;  %s1759_s7 = scalar_lea.vmem %s2243_s15, 4096 }
  0x74   : > { %516 = vmatpush1.bf16.msra.mxu0 %v1625_v6  ;;  %1433 = vmatprep.subr.bf16.mxu1 %v1659_v20  ;;  %v1666_v28 = vld [vmem:[#allocation7 + $0x20] sm:$0xff]   ;;  %v1646_v32 = vld [vmem:[%s2054_s9 + $0x28] sm:$0xff]   ;;  %v1647_v33 = vld [vmem:[%s2054_s9 + $0x30] sm:$0xff]   ;;  %p1760_p11 = scmp.ne.s32.totalorder %s2243_s15, %s1759_s7  ;;  %p2309_p0 = scmp.ne.s32.totalorder %s2304_s29, 0 }
  0x75   : > { %517 = vmatprep.subr.bf16.mxu0 %v1626_v7  ;;  %v1645_v31 = vld [vmem:[%s2054_s9 + $0x20] sm:$0xff]   ;;  %v1648_v34 = vld [vmem:[%s2054_s9 + $0x38] sm:$0xff]   ;;  %v1650_v36 = vld [vmem:[%s2054_s9 + $0x48] sm:$0xff]   ;;  %s1839_s6 = smov [#allocation8]  }
  0x76   : > { %v1649_v35 = vld [vmem:[%s2054_s9 + $0x40] sm:$0xff]   ;;  %v1651_v37 = vld [vmem:[%s2054_s9 + $0x50] sm:$0xff]   ;;  %v1667_v38 = vld [vmem:[#allocation7 + $0x68] sm:$0xff]   ;;  %p1761_p1 = pnand %p1760_p11, %p2309_p0  ;;  %s1763_s8 = sshll.u32 %s1839_s6, 4  ;;  %s1764_s8 = int_to_ptr.vmem [resolvable:$false] %s1763_s8 }
  0x77   : > { %1434 = vmatpush3.bf16.msra.mxu1 %v1660_v21  ;;  %v1668_v39 = vld [vmem:[#allocation7 + $0x28] sm:$0xff]   ;;  %v1652_v40 = vld [vmem:[%s2054_s9 + $0x58] sm:$0xff]   ;;  %v1669_v41 = vld [vmem:[#allocation7 + $0x70] sm:$0xff]   ;;  %p1766_p5 = scmp.lt.s32.totalorder %s2243_s15, %s1764_s8 }
  0x78   : > { %518 = vmatpush1.bf16.msra.mxu0 %v1628_v8  ;;  %1435 = vmatprep.subr.bf16.mxu1 %v1661_v22  ;;  %v1670_v42 = vld [vmem:[#allocation7 + $0x30] sm:$0xff]   ;;  %v1671_v43 = vld [vmem:[#allocation7 + $0x78] sm:$0xff]   ;;  %v1653_v45 = vld [vmem:[%s2054_s9 + $0x60] sm:$0xff]   ;;  %p1762_p3 = pneg %p1761_p1 }
  0x79   : > { %519 = vmatprep.subr.bf16.mxu0 %v1629_v9  ;;  %v1672_v44 = vld [vmem:[#allocation7 + $0x38] sm:$0xff]   ;;  %v1654_v46 = vld [vmem:[%s2054_s9 + $0x68] sm:$0xff]   ;;  %v1655_v47 = vld [vmem:[%s2054_s9 + $0x70] sm:$0xff]  }
  0x7a   : > { %v1656_v48 = vld [vmem:[%s2054_s9 + $0x78] sm:$0xff]   ;;  %v323_v52 = vld [vmem:[%s2292_s2] sm:$0x3]  ;;  %s1765_s9 = scalar_lea.vmem %s1764_s8, 8192 }
  0x7b   : > { %1436 = vmatpush3.bf16.msra.mxu1 %v1662_v23  ;;  %v2099_v54 = vrot.slane %v323_v52, %v327_v51  ;;  %v2101_v55 = vrot.slane %v323_v52, %v331_v53  ;;  %p1767_p9 = scmp.lt.s32.totalorder %s1765_s9, %s1759_s7 }
  0x7c   : > { %520 = vmatpush1.bf16.msra.mxu0 %v1631_v10  ;;  %1437 = vmatprep.subr.bf16.mxu1 %v1663_v24 }
  0x7d   : > { %521 = vmatprep.subr.bf16.mxu0 %v1632_v11  ;;  %p1768_p12 = por %p1767_p9, %p1766_p5 }
  0x7f   : > { %1438 = vmatpush3.bf16.msra.mxu1 %v1664_v26  ;;  %p1769_p2 = pnand %p1768_p12, %p1762_p3 }
  0x80   : > { %522 = vmatpush1.bf16.msra.mxu0 %v1634_v12  ;;  %1439 = vmatprep.subr.bf16.mxu1 %v1665_v27 }
  0x81   : > { %523 = vmatprep.subr.bf16.mxu0 %v1635_v13 }
  0x83   : > { %1440 = vmatpush3.bf16.msra.mxu1 %v1666_v28 }
  0x84   : > { %524 = vmatpush1.bf16.msra.mxu0 %v1637_v14  ;;  %1441 = vmatprep.subr.bf16.mxu1 %v1667_v38 }
  0x85   : > { %525 = vmatprep.subr.bf16.mxu0 %v1638_v15 }
  0x87   : > { %1442 = vmatpush3.bf16.msra.mxu1 %v1668_v39 }
  0x88   : > { %526 = vmatpush1.bf16.msra.mxu0 %v1640_v16  ;;  %1443 = vmatprep.subr.bf16.mxu1 %v1669_v41 }
  0x8b   : > { %544 = vmatmul.mubr.bf16.vlgmr.msra.gmra.mrb[0].mxu0 %v1641_v18  ;;  %1444 = vmatpush3.bf16.msra.mxu1 %v1670_v42 }
  0x8c   : > { %553 = vmatprep.mubr.bf16.mxu0 %v1838_v0  ;;  %1445 = vmatprep.subr.bf16.mxu1 %v1671_v43 }
  0x8f   : > { %1446 = vmatpush3.bf16.msra.mxu1 %v1672_v44 }
  0x93   : > { %554 = vmatmul.mubr.bf16.gmra.mrb[4].mxu0 %v1642_v25 }
  0x94   : > { %563 = vmatprep.mubr.bf16.mxu0 %v1838_v0 }
  0x9b   : > { %564 = vmatmul.mubr.bf16.gmra.mrb[8].mxu0 %v1643_v29 }
  0x9c   : > { %573 = vmatprep.mubr.bf16.mxu0 %v1838_v0 }
  0xa3   : > { %574 = vmatmul.mubr.bf16.gmra.mrb[12].mxu0 %v1644_v30 }
  0xa4   : > { %583 = vmatprep.mubr.bf16.mxu0 %v1838_v0 }
  0xab   : > { %584 = vmatmul.mubr.bf16.gmra.mrb[16].mxu0 %v1645_v31 }
  0xac   : > { %593 = vmatprep.mubr.bf16.mxu0 %v1838_v0 }
  0xb3   : > { %594 = vmatmul.mubr.bf16.gmra.mrb[20].mxu0 %v1646_v32 }
  0xb4   : > { %603 = vmatprep.mubr.bf16.mxu0 %v1838_v0 }
  0xbb   : > { %604 = vmatmul.mubr.bf16.gmra.mrb[24].mxu0 %v1647_v33 }
  0xbc   : > { %613 = vmatprep.mubr.bf16.mxu0 %v1838_v0 }
  0xc3   : > { %614 = vmatmul.mubr.bf16.gmra.mrb[28].mxu0 %v1648_v34 }
  0xc4   : > { %623 = vmatprep.mubr.bf16.mxu0 %v1838_v0 }
  0xcb   : > { %624 = vmatmul.mubr.bf16.gmra.mrb[32].mxu0 %v1649_v35 }
  0xcc   : > { %633 = vmatprep.mubr.bf16.mxu0 %v1838_v0 }
  0xd3   : > { %634 = vmatmul.mubr.bf16.gmra.mrb[36].mxu0 %v1650_v36 }
  0xd4   : > { %643 = vmatprep.mubr.bf16.mxu0 %v1838_v0 }
  0xdb   : > { %644 = vmatmul.mubr.bf16.gmra.mrb[40].mxu0 %v1651_v37 }
  0xdc   : > { %653 = vmatprep.mubr.bf16.mxu0 %v1838_v0 }
  0xe3   : > { %654 = vmatmul.mubr.bf16.gmra.mrb[44].mxu0 %v1652_v40 }
  0xe4   : > { %663 = vmatprep.mubr.bf16.mxu0 %v1838_v0 }
  0xeb   : > { %664 = vmatmul.mubr.bf16.gmra.mrb[48].mxu0 %v1653_v45 }
  0xec   : > { %673 = vmatprep.mubr.bf16.mxu0 %v1838_v0 }
  0xf3   : > { %674 = vmatmul.mubr.bf16.gmra.mrb[52].mxu0 %v1654_v46 }
  0xf4   : > { %683 = vmatprep.mubr.bf16.mxu0 %v1838_v0 }
  0xfb   : > { %684 = vmatmul.mubr.bf16.gmra.mrb[56].mxu0 %v1655_v47 }
  0xfc   : > { %693 = vmatprep.mubr.bf16.mxu0 %v1838_v0 }
 0x103   : > { %694 = vmatmul.mubr.bf16.gmra.mrb[60].mxu0 %v1656_v48 }
 0x15e   : > { %v545_v56 = vpop.f32.mrb[0].mxu0 }
 0x15f   : > { %v546_v57 = vadd.f32 %v545_v56, %v2099_v54  ;;  %v547_v58 = vpop.f32.mrb[1].mxu0 }
 0x160   : > { %v548_v59 = vadd.f32 %v547_v58, %v2101_v55  ;;  %v549_v60 = vpop.f32.mrb[2].mxu0 }
 0x161   : > { %v768_v61 = vmul.f32 0.01, %v546_v57  ;;  %v550_v62 = vadd.f32 %v549_v60, %v2099_v54  ;;  %v551_v63 = vpop.f32.mrb[3].mxu0  ;;  %vm704_vm0 = vcmp.ge.f32.partialorder %v546_v57, 0.0 }
 0x162   : > { %v769_v0 = vmul.f32 0.01, %v548_v59  ;;  %v552_v1 = vadd.f32 %v551_v63, %v2101_v55  ;;  %vm705_vm2 = vcmp.ge.f32.partialorder %v548_v59, 0.0 }
 0x163   : > { %vm706_vm1 = vcmp.ge.f32.partialorder %v550_v62, 0.0  ;;  %v770_v2 = vmul.f32 0.01, %v550_v62  ;;  %v832_v4 = vsel %vm704_vm0, %v546_v57, %v768_v61 }
 0x164   : > { %v771_v3 = vmul.f32 0.01, %v552_v1  ;;  %vm707_vm3 = vcmp.ge.f32.partialorder %v552_v1, 0.0  ;;  %v833_v7 = vsel %vm705_vm2, %v548_v59, %v769_v0 }
 0x165   : > { %v834_v5 = vsel %vm706_vm1, %v550_v62, %v770_v2 }
 0x166   : > { %v555_v6 = vpop.f32.mrb[4].mxu0  ;;  %v835_v8 = vsel %vm707_vm3, %v552_v1, %v771_v3  ;;  %v896_v9 = vpack.c.bf16 %v834_v5, %v832_v4 }
 0x167   : > { %v556_v10 = vadd.f32 %v555_v6, %v2099_v54  ;;  %v557_v11 = vpop.f32.mrb[5].mxu0  ;;  %v897_v12 = vpack.c.bf16 %v835_v8, %v833_v7 }
 0x168   : > { %v558_v13 = vadd.f32 %v557_v11, %v2101_v55  ;;  %v559_v14 = vpop.f32.mrb[6].mxu0 }
 0x169   : > { %v772_v15 = vmul.f32 0.01, %v556_v10  ;;  %v560_v16 = vadd.f32 %v559_v14, %v2099_v54  ;;  %v561_v17 = vpop.f32.mrb[7].mxu0  ;;  %1095 = vmatprep.mubr.bf16.mxu1 %v897_v12  ;;  %vm708_vm4 = vcmp.ge.f32.partialorder %v556_v10, 0.0 }
 0x16a   : > { %v773_v18 = vmul.f32 0.01, %v558_v13  ;;  %v562_v19 = vadd.f32 %v561_v17, %v2101_v55  ;;  %1096 = vmatmul.mubr.bf16.vlgmr.msra.gmra.mrb[0].mxu1 %v896_v9  ;;  %vm709_vm5 = vcmp.ge.f32.partialorder %v558_v13, 0.0 }
 0x16b   : > { %vm710_vm6 = vcmp.ge.f32.partialorder %v560_v16, 0.0  ;;  %v774_v20 = vmul.f32 0.01, %v560_v16  ;;  %v836_v22 = vsel %vm708_vm4, %v556_v10, %v772_v15 }
 0x16c   : > { %vm711_vm7 = vcmp.ge.f32.partialorder %v562_v19, 0.0  ;;  %v775_v21 = vmul.f32 0.01, %v562_v19  ;;  %v837_v25 = vsel %vm709_vm5, %v558_v13, %v773_v18 }
 0x16d   : > { %v838_v23 = vsel %vm710_vm6, %v560_v16, %v774_v20 }
 0x16e   : > { %v565_v24 = vpop.f32.mrb[8].mxu0  ;;  %v839_v26 = vsel %vm711_vm7, %v562_v19, %v775_v21  ;;  %v898_v27 = vpack.c.bf16 %v838_v23, %v836_v22 }
 0x16f   : > { %v566_v28 = vadd.f32 %v565_v24, %v2099_v54  ;;  %v567_v29 = vpop.f32.mrb[9].mxu0  ;;  %v899_v30 = vpack.c.bf16 %v839_v26, %v837_v25 }
 0x170   : > { %v568_v31 = vadd.f32 %v567_v29, %v2101_v55  ;;  %v569_v32 = vpop.f32.mrb[10].mxu0 }
 0x171   : > { %v776_v33 = vmul.f32 0.01, %v566_v28  ;;  %v570_v34 = vadd.f32 %v569_v32, %v2099_v54  ;;  %v571_v35 = vpop.f32.mrb[11].mxu0  ;;  %1103 = vmatprep.mubr.bf16.mxu1 %v899_v30  ;;  %vm712_vm8 = vcmp.ge.f32.partialorder %v566_v28, 0.0 }
 0x172   : > { %v777_v36 = vmul.f32 0.01, %v568_v31  ;;  %v572_v37 = vadd.f32 %v571_v35, %v2101_v55  ;;  %1104 = vmatmul.mubr.bf16.gmra.mrb[4].mxu1 %v898_v27  ;;  %vm713_vm9 = vcmp.ge.f32.partialorder %v568_v31, 0.0 }
 0x173   : > { %vm714_vm10 = vcmp.ge.f32.partialorder %v570_v34, 0.0  ;;  %v778_v38 = vmul.f32 0.01, %v570_v34  ;;  %v840_v40 = vsel %vm712_vm8, %v566_v28, %v776_v33 }
 0x174   : > { %vm715_vm11 = vcmp.ge.f32.partialorder %v572_v37, 0.0  ;;  %v779_v39 = vmul.f32 0.01, %v572_v37  ;;  %v841_v43 = vsel %vm713_vm9, %v568_v31, %v777_v36 }
 0x175   : > { %v842_v41 = vsel %vm714_vm10, %v570_v34, %v778_v38 }
 0x176   : > { %v575_v42 = vpop.f32.mrb[12].mxu0  ;;  %v843_v44 = vsel %vm715_vm11, %v572_v37, %v779_v39  ;;  %v900_v45 = vpack.c.bf16 %v842_v41, %v840_v40 }
 0x177   : > { %v576_v46 = vadd.f32 %v575_v42, %v2099_v54  ;;  %v577_v47 = vpop.f32.mrb[13].mxu0  ;;  %v901_v48 = vpack.c.bf16 %v843_v44, %v841_v43 }
 0x178   : > { %v578_v49 = vadd.f32 %v577_v47, %v2101_v55  ;;  %v579_v50 = vpop.f32.mrb[14].mxu0 }
 0x179   : > { %v780_v51 = vmul.f32 0.01, %v576_v46  ;;  %v580_v52 = vadd.f32 %v579_v50, %v2099_v54  ;;  %v581_v53 = vpop.f32.mrb[15].mxu0  ;;  %1111 = vmatprep.mubr.bf16.mxu1 %v901_v48  ;;  %vm716_vm12 = vcmp.ge.f32.partialorder %v576_v46, 0.0 }
 0x17a   : > { %v781_v56 = vmul.f32 0.01, %v578_v49  ;;  %v582_v57 = vadd.f32 %v581_v53, %v2101_v55  ;;  %1112 = vmatmul.mubr.bf16.gmra.mrb[8].mxu1 %v900_v45  ;;  %vm717_vm13 = vcmp.ge.f32.partialorder %v578_v49, 0.0 }
 0x17b   : > { %vm718_vm14 = vcmp.ge.f32.partialorder %v580_v52, 0.0  ;;  %v782_v58 = vmul.f32 0.01, %v580_v52  ;;  %v844_v60 = vsel %vm716_vm12, %v576_v46, %v780_v51 }
 0x17c   : > { %vm719_vm15 = vcmp.ge.f32.partialorder %v582_v57, 0.0  ;;  %v783_v59 = vmul.f32 0.01, %v582_v57  ;;  %v845_v63 = vsel %vm717_vm13, %v578_v49, %v781_v56 }
 0x17d   : > { %v846_v61 = vsel %vm718_vm14, %v580_v52, %v782_v58 }
 0x17e   : > { %v585_v62 = vpop.f32.mrb[16].mxu0  ;;  %v847_v0 = vsel %vm719_vm15, %v582_v57, %v783_v59  ;;  %v902_v1 = vpack.c.bf16 %v846_v61, %v844_v60 }
 0x17f   : > { %v586_v2 = vadd.f32 %v585_v62, %v2099_v54  ;;  %v587_v3 = vpop.f32.mrb[17].mxu0  ;;  %v903_v4 = vpack.c.bf16 %v847_v0, %v845_v63 }
 0x180   : > { %v588_v5 = vadd.f32 %v587_v3, %v2101_v55  ;;  %v589_v6 = vpop.f32.mrb[18].mxu0 }
 0x181   : > { %v784_v7 = vmul.f32 0.01, %v586_v2  ;;  %v590_v8 = vadd.f32 %v589_v6, %v2099_v54  ;;  %v591_v9 = vpop.f32.mrb[19].mxu0  ;;  %1119 = vmatprep.mubr.bf16.mxu1 %v903_v4  ;;  %vm720_vm0 = vcmp.ge.f32.partialorder %v586_v2, 0.0 }
 0x182   : > { %v785_v10 = vmul.f32 0.01, %v588_v5  ;;  %v592_v11 = vadd.f32 %v591_v9, %v2101_v55  ;;  %1120 = vmatmul.mubr.bf16.gmra.mrb[12].mxu1 %v902_v1  ;;  %vm721_vm1 = vcmp.ge.f32.partialorder %v588_v5, 0.0 }
 0x183   : > { %vm722_vm2 = vcmp.ge.f32.partialorder %v590_v8, 0.0  ;;  %v786_v12 = vmul.f32 0.01, %v590_v8  ;;  %v848_v14 = vsel %vm720_vm0, %v586_v2, %v784_v7 }
 0x184   : > { %vm723_vm3 = vcmp.ge.f32.partialorder %v592_v11, 0.0  ;;  %v787_v13 = vmul.f32 0.01, %v592_v11  ;;  %v849_v17 = vsel %vm721_vm1, %v588_v5, %v785_v10 }
 0x185   : > { %v850_v15 = vsel %vm722_vm2, %v590_v8, %v786_v12 }
 0x186   : > { %v595_v16 = vpop.f32.mrb[20].mxu0  ;;  %v851_v18 = vsel %vm723_vm3, %v592_v11, %v787_v13  ;;  %v904_v19 = vpack.c.bf16 %v850_v15, %v848_v14 }
 0x187   : > { %v596_v20 = vadd.f32 %v595_v16, %v2099_v54  ;;  %v597_v21 = vpop.f32.mrb[21].mxu0  ;;  %v905_v22 = vpack.c.bf16 %v851_v18, %v849_v17 }
 0x188   : > { %v598_v23 = vadd.f32 %v597_v21, %v2101_v55  ;;  %v599_v24 = vpop.f32.mrb[22].mxu0 }
 0x189   : > { %v788_v25 = vmul.f32 0.01, %v596_v20  ;;  %v600_v26 = vadd.f32 %v599_v24, %v2099_v54  ;;  %v601_v27 = vpop.f32.mrb[23].mxu0  ;;  %1127 = vmatprep.mubr.bf16.mxu1 %v905_v22  ;;  %vm724_vm4 = vcmp.ge.f32.partialorder %v596_v20, 0.0 }
 0x18a   : > { %v789_v28 = vmul.f32 0.01, %v598_v23  ;;  %v602_v29 = vadd.f32 %v601_v27, %v2101_v55  ;;  %1128 = vmatmul.mubr.bf16.gmra.mrb[16].mxu1 %v904_v19  ;;  %vm725_vm5 = vcmp.ge.f32.partialorder %v598_v23, 0.0 }
 0x18b   : > { %vm726_vm6 = vcmp.ge.f32.partialorder %v600_v26, 0.0  ;;  %v790_v30 = vmul.f32 0.01, %v600_v26  ;;  %v852_v32 = vsel %vm724_vm4, %v596_v20, %v788_v25 }
 0x18c   : > { %vm727_vm7 = vcmp.ge.f32.partialorder %v602_v29, 0.0  ;;  %v791_v31 = vmul.f32 0.01, %v602_v29  ;;  %v853_v35 = vsel %vm725_vm5, %v598_v23, %v789_v28 }
 0x18d   : > { %v854_v33 = vsel %vm726_vm6, %v600_v26, %v790_v30 }
 0x18e   : > { %v605_v34 = vpop.f32.mrb[24].mxu0  ;;  %v855_v36 = vsel %vm727_vm7, %v602_v29, %v791_v31  ;;  %v906_v37 = vpack.c.bf16 %v854_v33, %v852_v32 }
 0x18f   : > { %v606_v38 = vadd.f32 %v605_v34, %v2099_v54  ;;  %v607_v39 = vpop.f32.mrb[25].mxu0  ;;  %v907_v40 = vpack.c.bf16 %v855_v36, %v853_v35 }
 0x190   : > { %v608_v41 = vadd.f32 %v607_v39, %v2101_v55  ;;  %v609_v42 = vpop.f32.mrb[26].mxu0 }
 0x191   : > { %v792_v43 = vmul.f32 0.01, %v606_v38  ;;  %v610_v44 = vadd.f32 %v609_v42, %v2099_v54  ;;  %v611_v45 = vpop.f32.mrb[27].mxu0  ;;  %1135 = vmatprep.mubr.bf16.mxu1 %v907_v40  ;;  %vm728_vm8 = vcmp.ge.f32.partialorder %v606_v38, 0.0 }
 0x192   : > { %v793_v46 = vmul.f32 0.01, %v608_v41  ;;  %v612_v47 = vadd.f32 %v611_v45, %v2101_v55  ;;  %1136 = vmatmul.mubr.bf16.gmra.mrb[20].mxu1 %v906_v37  ;;  %vm729_vm9 = vcmp.ge.f32.partialorder %v608_v41, 0.0 }
 0x193   : > { %vm730_vm10 = vcmp.ge.f32.partialorder %v610_v44, 0.0  ;;  %v794_v48 = vmul.f32 0.01, %v610_v44  ;;  %v856_v50 = vsel %vm728_vm8, %v606_v38, %v792_v43 }
 0x194   : > { %vm731_vm11 = vcmp.ge.f32.partialorder %v612_v47, 0.0  ;;  %v795_v49 = vmul.f32 0.01, %v612_v47  ;;  %v857_v53 = vsel %vm729_vm9, %v608_v41, %v793_v46 }
 0x195   : > { %v858_v51 = vsel %vm730_vm10, %v610_v44, %v794_v48 }
 0x196   : > { %v615_v52 = vpop.f32.mrb[28].mxu0  ;;  %v859_v56 = vsel %vm731_vm11, %v612_v47, %v795_v49  ;;  %v908_v57 = vpack.c.bf16 %v858_v51, %v856_v50 }
 0x197   : > { %v616_v58 = vadd.f32 %v615_v52, %v2099_v54  ;;  %v617_v59 = vpop.f32.mrb[29].mxu0  ;;  %v909_v60 = vpack.c.bf16 %v859_v56, %v857_v53 }
 0x198   : > { %v618_v61 = vadd.f32 %v617_v59, %v2101_v55  ;;  %v619_v62 = vpop.f32.mrb[30].mxu0 }
 0x199   : > { %v796_v63 = vmul.f32 0.01, %v616_v58  ;;  %v620_v0 = vadd.f32 %v619_v62, %v2099_v54  ;;  %v621_v1 = vpop.f32.mrb[31].mxu0  ;;  %1143 = vmatprep.mubr.bf16.mxu1 %v909_v60  ;;  %vm732_vm12 = vcmp.ge.f32.partialorder %v616_v58, 0.0 }
 0x19a   : > { %v797_v2 = vmul.f32 0.01, %v618_v61  ;;  %v622_v3 = vadd.f32 %v621_v1, %v2101_v55  ;;  %1144 = vmatmul.mubr.bf16.gmra.mrb[24].mxu1 %v908_v57  ;;  %vm733_vm13 = vcmp.ge.f32.partialorder %v618_v61, 0.0 }
 0x19b   : > { %vm734_vm14 = vcmp.ge.f32.partialorder %v620_v0, 0.0  ;;  %v798_v4 = vmul.f32 0.01, %v620_v0  ;;  %v860_v6 = vsel %vm732_vm12, %v616_v58, %v796_v63 }
 0x19c   : > { %vm735_vm15 = vcmp.ge.f32.partialorder %v622_v3, 0.0  ;;  %v799_v5 = vmul.f32 0.01, %v622_v3  ;;  %v861_v9 = vsel %vm733_vm13, %v618_v61, %v797_v2 }
 0x19d   : > { %v862_v7 = vsel %vm734_vm14, %v620_v0, %v798_v4 }
 0x19e   : > { %v625_v8 = vpop.f32.mrb[32].mxu0  ;;  %v863_v10 = vsel %vm735_vm15, %v622_v3, %v799_v5  ;;  %v910_v11 = vpack.c.bf16 %v862_v7, %v860_v6 }
 0x19f   : > { %v626_v12 = vadd.f32 %v625_v8, %v2099_v54  ;;  %v627_v13 = vpop.f32.mrb[33].mxu0  ;;  %v911_v14 = vpack.c.bf16 %v863_v10, %v861_v9 }
 0x1a0   : > { %v628_v15 = vadd.f32 %v627_v13, %v2101_v55  ;;  %v629_v16 = vpop.f32.mrb[34].mxu0 }
 0x1a1   : > { %v800_v17 = vmul.f32 0.01, %v626_v12  ;;  %v630_v18 = vadd.f32 %v629_v16, %v2099_v54  ;;  %v631_v19 = vpop.f32.mrb[35].mxu0  ;;  %1151 = vmatprep.mubr.bf16.mxu1 %v911_v14  ;;  %vm736_vm0 = vcmp.ge.f32.partialorder %v626_v12, 0.0 }
 0x1a2   : > { %v801_v20 = vmul.f32 0.01, %v628_v15  ;;  %v632_v21 = vadd.f32 %v631_v19, %v2101_v55  ;;  %1152 = vmatmul.mubr.bf16.gmra.mrb[28].mxu1 %v910_v11  ;;  %vm737_vm1 = vcmp.ge.f32.partialorder %v628_v15, 0.0 }
 0x1a3   : > { %vm738_vm2 = vcmp.ge.f32.partialorder %v630_v18, 0.0  ;;  %v802_v22 = vmul.f32 0.01, %v630_v18  ;;  %v864_v24 = vsel %vm736_vm0, %v626_v12, %v800_v17 }
 0x1a4   : > { %vm739_vm3 = vcmp.ge.f32.partialorder %v632_v21, 0.0  ;;  %v803_v23 = vmul.f32 0.01, %v632_v21  ;;  %v865_v27 = vsel %vm737_vm1, %v628_v15, %v801_v20 }
 0x1a5   : > { %v866_v25 = vsel %vm738_vm2, %v630_v18, %v802_v22 }
 0x1a6   : > { %v635_v26 = vpop.f32.mrb[36].mxu0  ;;  %v867_v28 = vsel %vm739_vm3, %v632_v21, %v803_v23  ;;  %v912_v29 = vpack.c.bf16 %v866_v25, %v864_v24 }
 0x1a7   : > { %v636_v30 = vadd.f32 %v635_v26, %v2099_v54  ;;  %v637_v31 = vpop.f32.mrb[37].mxu0  ;;  %v913_v32 = vpack.c.bf16 %v867_v28, %v865_v27 }
 0x1a8   : > { %v638_v33 = vadd.f32 %v637_v31, %v2101_v55  ;;  %v639_v34 = vpop.f32.mrb[38].mxu0 }
 0x1a9   : > { %v804_v35 = vmul.f32 0.01, %v636_v30  ;;  %v640_v36 = vadd.f32 %v639_v34, %v2099_v54  ;;  %v641_v37 = vpop.f32.mrb[39].mxu0  ;;  %1159 = vmatprep.mubr.bf16.mxu1 %v913_v32  ;;  %vm740_vm4 = vcmp.ge.f32.partialorder %v636_v30, 0.0 }
 0x1aa   : > { %v805_v38 = vmul.f32 0.01, %v638_v33  ;;  %v642_v39 = vadd.f32 %v641_v37, %v2101_v55  ;;  %1160 = vmatmul.mubr.bf16.gmra.mrb[32].mxu1 %v912_v29  ;;  %vm741_vm5 = vcmp.ge.f32.partialorder %v638_v33, 0.0 }
 0x1ab   : > { %vm742_vm6 = vcmp.ge.f32.partialorder %v640_v36, 0.0  ;;  %v806_v40 = vmul.f32 0.01, %v640_v36  ;;  %v868_v42 = vsel %vm740_vm4, %v636_v30, %v804_v35 }
 0x1ac   : > { %vm743_vm7 = vcmp.ge.f32.partialorder %v642_v39, 0.0  ;;  %v807_v41 = vmul.f32 0.01, %v642_v39  ;;  %v869_v45 = vsel %vm741_vm5, %v638_v33, %v805_v38 }
 0x1ad   : > { %v870_v43 = vsel %vm742_vm6, %v640_v36, %v806_v40 }
 0x1ae   : > { %v645_v44 = vpop.f32.mrb[40].mxu0  ;;  %v871_v46 = vsel %vm743_vm7, %v642_v39, %v807_v41  ;;  %v914_v47 = vpack.c.bf16 %v870_v43, %v868_v42 }
 0x1af   : > { %v646_v48 = vadd.f32 %v645_v44, %v2099_v54  ;;  %v647_v49 = vpop.f32.mrb[41].mxu0  ;;  %v915_v50 = vpack.c.bf16 %v871_v46, %v869_v45 }
 0x1b0   : > { %v648_v51 = vadd.f32 %v647_v49, %v2101_v55  ;;  %v649_v52 = vpop.f32.mrb[42].mxu0 }
 0x1b1   : > { %v808_v53 = vmul.f32 0.01, %v646_v48  ;;  %v650_v56 = vadd.f32 %v649_v52, %v2099_v54  ;;  %v651_v57 = vpop.f32.mrb[43].mxu0  ;;  %1167 = vmatprep.mubr.bf16.mxu1 %v915_v50  ;;  %vm744_vm8 = vcmp.ge.f32.partialorder %v646_v48, 0.0 }
 0x1b2   : > { %v809_v58 = vmul.f32 0.01, %v648_v51  ;;  %v652_v59 = vadd.f32 %v651_v57, %v2101_v55  ;;  %1168 = vmatmul.mubr.bf16.gmra.mrb[36].mxu1 %v914_v47  ;;  %vm745_vm9 = vcmp.ge.f32.partialorder %v648_v51, 0.0 }
 0x1b3   : > { %vm746_vm10 = vcmp.ge.f32.partialorder %v650_v56, 0.0  ;;  %v810_v60 = vmul.f32 0.01, %v650_v56  ;;  %v872_v62 = vsel %vm744_vm8, %v646_v48, %v808_v53 }
 0x1b4   : > { %vm747_vm11 = vcmp.ge.f32.partialorder %v652_v59, 0.0  ;;  %v811_v61 = vmul.f32 0.01, %v652_v59  ;;  %v873_v1 = vsel %vm745_vm9, %v648_v51, %v809_v58 }
 0x1b5   : > { %v874_v63 = vsel %vm746_vm10, %v650_v56, %v810_v60 }
 0x1b6   : > { %v655_v0 = vpop.f32.mrb[44].mxu0  ;;  %v875_v2 = vsel %vm747_vm11, %v652_v59, %v811_v61  ;;  %v916_v3 = vpack.c.bf16 %v874_v63, %v872_v62 }
 0x1b7   : > { %v656_v4 = vadd.f32 %v655_v0, %v2099_v54  ;;  %v657_v5 = vpop.f32.mrb[45].mxu0  ;;  %v917_v6 = vpack.c.bf16 %v875_v2, %v873_v1 }
 0x1b8   : > { %v658_v7 = vadd.f32 %v657_v5, %v2101_v55  ;;  %v659_v8 = vpop.f32.mrb[46].mxu0 }
 0x1b9   : > { %v812_v9 = vmul.f32 0.01, %v656_v4  ;;  %v660_v10 = vadd.f32 %v659_v8, %v2099_v54  ;;  %v661_v11 = vpop.f32.mrb[47].mxu0  ;;  %1175 = vmatprep.mubr.bf16.mxu1 %v917_v6  ;;  %vm748_vm12 = vcmp.ge.f32.partialorder %v656_v4, 0.0 }
 0x1ba   : > { %v813_v12 = vmul.f32 0.01, %v658_v7  ;;  %v662_v13 = vadd.f32 %v661_v11, %v2101_v55  ;;  %1176 = vmatmul.mubr.bf16.gmra.mrb[40].mxu1 %v916_v3  ;;  %vm749_vm13 = vcmp.ge.f32.partialorder %v658_v7, 0.0 }
 0x1bb   : > { %vm750_vm14 = vcmp.ge.f32.partialorder %v660_v10, 0.0  ;;  %v814_v14 = vmul.f32 0.01, %v660_v10  ;;  %v876_v16 = vsel %vm748_vm12, %v656_v4, %v812_v9 }
 0x1bc   : > { %vm751_vm15 = vcmp.ge.f32.partialorder %v662_v13, 0.0  ;;  %v815_v15 = vmul.f32 0.01, %v662_v13  ;;  %v877_v19 = vsel %vm749_vm13, %v658_v7, %v813_v12 }
 0x1bd   : > { %v878_v17 = vsel %vm750_vm14, %v660_v10, %v814_v14 }
 0x1be   : > { %v665_v18 = vpop.f32.mrb[48].mxu0  ;;  %v879_v20 = vsel %vm751_vm15, %v662_v13, %v815_v15  ;;  %v918_v21 = vpack.c.bf16 %v878_v17, %v876_v16 }
 0x1bf   : > { %v666_v22 = vadd.f32 %v665_v18, %v2099_v54  ;;  %v667_v23 = vpop.f32.mrb[49].mxu0  ;;  %v919_v24 = vpack.c.bf16 %v879_v20, %v877_v19 }
 0x1c0   : > { %v668_v25 = vadd.f32 %v667_v23, %v2101_v55  ;;  %v669_v26 = vpop.f32.mrb[50].mxu0 }
 0x1c1   : > { %v816_v27 = vmul.f32 0.01, %v666_v22  ;;  %v670_v28 = vadd.f32 %v669_v26, %v2099_v54  ;;  %v671_v29 = vpop.f32.mrb[51].mxu0  ;;  %1183 = vmatprep.mubr.bf16.mxu1 %v919_v24  ;;  %vm752_vm0 = vcmp.ge.f32.partialorder %v666_v22, 0.0 }
 0x1c2   : > { %v817_v30 = vmul.f32 0.01, %v668_v25  ;;  %v672_v31 = vadd.f32 %v671_v29, %v2101_v55  ;;  %1184 = vmatmul.mubr.bf16.gmra.mrb[44].mxu1 %v918_v21  ;;  %vm753_vm1 = vcmp.ge.f32.partialorder %v668_v25, 0.0 }
 0x1c3   : > { %vm754_vm2 = vcmp.ge.f32.partialorder %v670_v28, 0.0  ;;  %v818_v32 = vmul.f32 0.01, %v670_v28  ;;  %v880_v34 = vsel %vm752_vm0, %v666_v22, %v816_v27 }
 0x1c4   : > { %vm755_vm3 = vcmp.ge.f32.partialorder %v672_v31, 0.0  ;;  %v819_v33 = vmul.f32 0.01, %v672_v31  ;;  %v881_v37 = vsel %vm753_vm1, %v668_v25, %v817_v30 }
 0x1c5   : > { %v882_v35 = vsel %vm754_vm2, %v670_v28, %v818_v32 }
 0x1c6   : > { %v675_v36 = vpop.f32.mrb[52].mxu0  ;;  %v883_v38 = vsel %vm755_vm3, %v672_v31, %v819_v33  ;;  %v920_v39 = vpack.c.bf16 %v882_v35, %v880_v34 }
 0x1c7   : > { %v676_v40 = vadd.f32 %v675_v36, %v2099_v54  ;;  %v677_v41 = vpop.f32.mrb[53].mxu0  ;;  %v921_v42 = vpack.c.bf16 %v883_v38, %v881_v37 }
 0x1c8   : > { %v678_v43 = vadd.f32 %v677_v41, %v2101_v55  ;;  %v679_v44 = vpop.f32.mrb[54].mxu0 }
 0x1c9   : > { %v820_v45 = vmul.f32 0.01, %v676_v40  ;;  %v680_v46 = vadd.f32 %v679_v44, %v2099_v54  ;;  %v681_v47 = vpop.f32.mrb[55].mxu0  ;;  %1191 = vmatprep.mubr.bf16.mxu1 %v921_v42  ;;  %vm756_vm4 = vcmp.ge.f32.partialorder %v676_v40, 0.0 }
 0x1ca   : > { %v821_v48 = vmul.f32 0.01, %v678_v43  ;;  %v682_v49 = vadd.f32 %v681_v47, %v2101_v55  ;;  %1192 = vmatmul.mubr.bf16.gmra.mrb[48].mxu1 %v920_v39  ;;  %vm757_vm5 = vcmp.ge.f32.partialorder %v678_v43, 0.0 }
 0x1cb   : > { %vm758_vm6 = vcmp.ge.f32.partialorder %v680_v46, 0.0  ;;  %v822_v50 = vmul.f32 0.01, %v680_v46  ;;  %v884_v52 = vsel %vm756_vm4, %v676_v40, %v820_v45 }
 0x1cc   : > { %vm759_vm7 = vcmp.ge.f32.partialorder %v682_v49, 0.0  ;;  %v823_v51 = vmul.f32 0.01, %v682_v49  ;;  %v885_v57 = vsel %vm757_vm5, %v678_v43, %v821_v48 }
 0x1cd   : > { %v886_v53 = vsel %vm758_vm6, %v680_v46, %v822_v50 }
 0x1ce   : > { %v685_v56 = vpop.f32.mrb[56].mxu0  ;;  %v887_v58 = vsel %vm759_vm7, %v682_v49, %v823_v51  ;;  %v922_v59 = vpack.c.bf16 %v886_v53, %v884_v52 }
 0x1cf   : > { %v686_v60 = vadd.f32 %v685_v56, %v2099_v54  ;;  %v687_v61 = vpop.f32.mrb[57].mxu0  ;;  %v923_v62 = vpack.c.bf16 %v887_v58, %v885_v57 }
 0x1d0   : > { %v688_v63 = vadd.f32 %v687_v61, %v2101_v55  ;;  %v689_v0 = vpop.f32.mrb[58].mxu0 }
 0x1d1   : > { %v824_v1 = vmul.f32 0.01, %v686_v60  ;;  %v690_v2 = vadd.f32 %v689_v0, %v2099_v54  ;;  %v691_v3 = vpop.f32.mrb[59].mxu0  ;;  %1199 = vmatprep.mubr.bf16.mxu1 %v923_v62  ;;  %vm760_vm8 = vcmp.ge.f32.partialorder %v686_v60, 0.0 }
 0x1d2   : > { %v825_v4 = vmul.f32 0.01, %v688_v63  ;;  %v692_v5 = vadd.f32 %v691_v3, %v2101_v55  ;;  %1200 = vmatmul.mubr.bf16.gmra.mrb[52].mxu1 %v922_v59  ;;  %vm761_vm9 = vcmp.ge.f32.partialorder %v688_v63, 0.0 }
 0x1d3   : > { %vm762_vm10 = vcmp.ge.f32.partialorder %v690_v2, 0.0  ;;  %v826_v6 = vmul.f32 0.01, %v690_v2  ;;  %v888_v8 = vsel %vm760_vm8, %v686_v60, %v824_v1 }
 0x1d4   : > { %vm763_vm11 = vcmp.ge.f32.partialorder %v692_v5, 0.0  ;;  %v827_v7 = vmul.f32 0.01, %v692_v5  ;;  %v889_v11 = vsel %vm761_vm9, %v688_v63, %v825_v4 }
 0x1d5   : > { %v890_v9 = vsel %vm762_vm10, %v690_v2, %v826_v6 }
 0x1d6   : > { %v695_v10 = vpop.f32.mrb[60].mxu0  ;;  %v891_v12 = vsel %vm763_vm11, %v692_v5, %v827_v7  ;;  %v924_v13 = vpack.c.bf16 %v890_v9, %v888_v8 }
 0x1d7   : > { %v696_v14 = vadd.f32 %v695_v10, %v2099_v54  ;;  %v697_v15 = vpop.f32.mrb[61].mxu0  ;;  %v925_v16 = vpack.c.bf16 %v891_v12, %v889_v11 }
 0x1d8   : > { %v698_v17 = vadd.f32 %v697_v15, %v2101_v55  ;;  %v699_v18 = vpop.f32.mrb[62].mxu0 }
 0x1d9   : > { %v828_v19 = vmul.f32 0.01, %v696_v14  ;;  %v700_v20 = vadd.f32 %v699_v18, %v2099_v54  ;;  %v701_v21 = vpop.f32.mrb[63].mxu0  ;;  %1207 = vmatprep.mubr.bf16.mxu1 %v925_v16  ;;  %vm764_vm12 = vcmp.ge.f32.partialorder %v696_v14, 0.0 }
 0x1da   : > { %v829_v22 = vmul.f32 0.01, %v698_v17  ;;  %v702_v23 = vadd.f32 %v701_v21, %v2101_v55  ;;  %1208 = vmatmul.mubr.bf16.gmra.mrb[56].mxu1 %v924_v13  ;;  %vm765_vm13 = vcmp.ge.f32.partialorder %v698_v17, 0.0  ;;  %v2171_v55 = vld [vmem:[%s2294_s4] ss:$0 sm:$0xff] }
 0x1db   : > { %vm766_vm14 = vcmp.ge.f32.partialorder %v700_v20, 0.0  ;;  %v830_v24 = vmul.f32 0.01, %v700_v20  ;;  %v892_v26 = vsel %vm764_vm12, %v696_v14, %v828_v19 }
 0x1dc   : > { %vm767_vm15 = vcmp.ge.f32.partialorder %v702_v23, 0.0  ;;  %v831_v25 = vmul.f32 0.01, %v702_v23  ;;  %v893_v28 = vsel %vm765_vm13, %v698_v17, %v829_v22 }
 0x1dd   : > { %v894_v27 = vsel %vm766_vm14, %v700_v20, %v830_v24 }
 0x1de   : > { %v895_v29 = vsel %vm767_vm15, %v702_v23, %v831_v25  ;;  %v926_v30 = vpack.c.bf16 %v894_v27, %v892_v26 }
 0x1df   : > { %v927_v31 = vpack.c.bf16 %v895_v29, %v893_v28 }
 0x1e1   : > { %1215 = vmatprep.mubr.bf16.mxu1 %v927_v31 }
 0x1e2   : > { %1216 = vmatmul.mubr.bf16.gmra.mrb[60].mxu1 %v926_v30 }
 0x23d   : > { %v1447_v54 = vpop.f32.mrb[0].mxu1 }
 0x23e   : > { %v1448_v32 = vpop.f32.mrb[1].mxu1 }
 0x23f   : > { %v1449_v33 = vadd.f32 %v1448_v32, %v1447_v54  ;;  %v1450_v34 = vpop.f32.mrb[2].mxu1 }
 0x240   : > { %v1451_v35 = vpop.f32.mrb[3].mxu1 }
 0x241   : > { %v1098_v36 = vadd.f32 %v1449_v33, %v2171_v55  ;;  %v1452_v37 = vadd.f32 %v1451_v35, %v1450_v34 }
 0x243   : > { %1224 = vst [vmem:[%s2174_s28] sm:$0xff] %v1098_v36  ;;  %v1101_v38 = vadd.f32 %v1452_v37, %v2171_v55 }
 0x245   : > { %1225 = vst [vmem:[%s2174_s28 + $0x8] sm:$0xff] %v1101_v38  ;;  %v1453_v39 = vpop.f32.mrb[4].mxu1 }
 0x246   : > { %v1454_v40 = vpop.f32.mrb[5].mxu1 }
 0x247   : > { %v1455_v41 = vadd.f32 %v1454_v40, %v1453_v39  ;;  %v1456_v42 = vpop.f32.mrb[6].mxu1 }
 0x248   : > { %v1457_v43 = vpop.f32.mrb[7].mxu1 }
 0x249   : > { %v1106_v44 = vadd.f32 %v1455_v41, %v2171_v55  ;;  %v1458_v45 = vadd.f32 %v1457_v43, %v1456_v42 }
 0x24b   : > { %1226 = vst [vmem:[%s2174_s28 + $0x10] sm:$0xff] %v1106_v44  ;;  %v1109_v46 = vadd.f32 %v1458_v45, %v2171_v55 }
 0x24d   : > { %1227 = vst [vmem:[%s2174_s28 + $0x18] sm:$0xff] %v1109_v46  ;;  %v1459_v47 = vpop.f32.mrb[8].mxu1 }
 0x24e   : > { %v1460_v48 = vpop.f32.mrb[9].mxu1 }
 0x24f   : > { %v1461_v49 = vadd.f32 %v1460_v48, %v1459_v47  ;;  %v1462_v50 = vpop.f32.mrb[10].mxu1 }
 0x250   : > { %v1463_v51 = vpop.f32.mrb[11].mxu1 }
 0x251   : > { %v1114_v52 = vadd.f32 %v1461_v49, %v2171_v55  ;;  %v1464_v53 = vadd.f32 %v1463_v51, %v1462_v50 }
 0x253   : > { %1228 = vst [vmem:[%s2174_s28 + $0x20] sm:$0xff] %v1114_v52  ;;  %v1117_v56 = vadd.f32 %v1464_v53, %v2171_v55 }
 0x255   : > { %1229 = vst [vmem:[%s2174_s28 + $0x28] sm:$0xff] %v1117_v56  ;;  %v1465_v57 = vpop.f32.mrb[12].mxu1 }
 0x256   : > { %v1466_v58 = vpop.f32.mrb[13].mxu1 }
 0x257   : > { %v1467_v59 = vadd.f32 %v1466_v58, %v1465_v57  ;;  %v1468_v60 = vpop.f32.mrb[14].mxu1 }
 0x258   : > { %v1469_v61 = vpop.f32.mrb[15].mxu1 }
 0x259   : > { %v1122_v62 = vadd.f32 %v1467_v59, %v2171_v55  ;;  %v1470_v63 = vadd.f32 %v1469_v61, %v1468_v60 }
 0x25b   : > { %1230 = vst [vmem:[%s2174_s28 + $0x30] sm:$0xff] %v1122_v62  ;;  %v1125_v0 = vadd.f32 %v1470_v63, %v2171_v55 }
 0x25d   : > { %1231 = vst [vmem:[%s2174_s28 + $0x38] sm:$0xff] %v1125_v0  ;;  %v1471_v1 = vpop.f32.mrb[16].mxu1 }
 0x25e   : > { %v1472_v2 = vpop.f32.mrb[17].mxu1 }
 0x25f   : > { %v1473_v3 = vadd.f32 %v1472_v2, %v1471_v1  ;;  %v1474_v4 = vpop.f32.mrb[18].mxu1 }
 0x260   : > { %v1475_v5 = vpop.f32.mrb[19].mxu1 }
 0x261   : > { %v1130_v6 = vadd.f32 %v1473_v3, %v2171_v55  ;;  %v1476_v7 = vadd.f32 %v1475_v5, %v1474_v4 }
 0x263   : > { %1232 = vst [vmem:[%s2174_s28 + $0x40] sm:$0xff] %v1130_v6  ;;  %v1133_v8 = vadd.f32 %v1476_v7, %v2171_v55 }
 0x265   : > { %1233 = vst [vmem:[%s2174_s28 + $0x48] sm:$0xff] %v1133_v8  ;;  %v1477_v9 = vpop.f32.mrb[20].mxu1 }
 0x266   : > { %v1478_v10 = vpop.f32.mrb[21].mxu1 }
 0x267   : > { %v1479_v11 = vadd.f32 %v1478_v10, %v1477_v9  ;;  %v1480_v12 = vpop.f32.mrb[22].mxu1 }
 0x268   : > { %v1481_v13 = vpop.f32.mrb[23].mxu1 }
 0x269   : > { %v1138_v14 = vadd.f32 %v1479_v11, %v2171_v55  ;;  %v1482_v15 = vadd.f32 %v1481_v13, %v1480_v12 }
 0x26b   : > { %1234 = vst [vmem:[%s2174_s28 + $0x50] sm:$0xff] %v1138_v14  ;;  %v1141_v16 = vadd.f32 %v1482_v15, %v2171_v55 }
 0x26d   : > { %1235 = vst [vmem:[%s2174_s28 + $0x58] sm:$0xff] %v1141_v16  ;;  %v1483_v17 = vpop.f32.mrb[24].mxu1 }
 0x26e   : > { %v1484_v18 = vpop.f32.mrb[25].mxu1 }
 0x26f   : > { %v1485_v19 = vadd.f32 %v1484_v18, %v1483_v17  ;;  %v1486_v20 = vpop.f32.mrb[26].mxu1 }
 0x270   : > { %v1487_v21 = vpop.f32.mrb[27].mxu1 }
 0x271   : > { %v1146_v22 = vadd.f32 %v1485_v19, %v2171_v55  ;;  %v1488_v23 = vadd.f32 %v1487_v21, %v1486_v20 }
 0x273   : > { %1236 = vst [vmem:[%s2174_s28 + $0x60] sm:$0xff] %v1146_v22  ;;  %v1149_v24 = vadd.f32 %v1488_v23, %v2171_v55 }
 0x275   : > { %1237 = vst [vmem:[%s2174_s28 + $0x68] sm:$0xff] %v1149_v24  ;;  %v1489_v25 = vpop.f32.mrb[28].mxu1 }
 0x276   : > { %v1490_v26 = vpop.f32.mrb[29].mxu1 }
 0x277   : > { %v1491_v27 = vadd.f32 %v1490_v26, %v1489_v25  ;;  %v1492_v28 = vpop.f32.mrb[30].mxu1 }
 0x278   : > { %v1493_v29 = vpop.f32.mrb[31].mxu1 }
 0x279   : > { %v1154_v30 = vadd.f32 %v1491_v27, %v2171_v55  ;;  %v1494_v31 = vadd.f32 %v1493_v29, %v1492_v28 }
 0x27b   : > { %1238 = vst [vmem:[%s2174_s28 + $0x70] sm:$0xff] %v1154_v30  ;;  %v1157_v54 = vadd.f32 %v1494_v31, %v2171_v55 }
 0x27d   : > { %1239 = vst [vmem:[%s2174_s28 + $0x78] sm:$0xff] %v1157_v54  ;;  %v1495_v32 = vpop.f32.mrb[32].mxu1 }
 0x27e   : > { %v1496_v33 = vpop.f32.mrb[33].mxu1 }
 0x27f   : > { %v1497_v34 = vadd.f32 %v1496_v33, %v1495_v32  ;;  %v1498_v35 = vpop.f32.mrb[34].mxu1 }
 0x280   : > { %v1499_v36 = vpop.f32.mrb[35].mxu1 }
 0x281   : > { %v1162_v37 = vadd.f32 %v1497_v34, %v2171_v55  ;;  %v1500_v38 = vadd.f32 %v1499_v36, %v1498_v35 }
 0x283   : > { %1240 = vst [vmem:[%s2174_s28 + $0x80] sm:$0xff] %v1162_v37  ;;  %v1165_v39 = vadd.f32 %v1500_v38, %v2171_v55 }
 0x285   : > { %1241 = vst [vmem:[%s2174_s28 + $0x88] sm:$0xff] %v1165_v39  ;;  %v1501_v40 = vpop.f32.mrb[36].mxu1 }
 0x286   : > { %v1502_v41 = vpop.f32.mrb[37].mxu1 }
 0x287   : > { %v1503_v42 = vadd.f32 %v1502_v41, %v1501_v40  ;;  %v1504_v43 = vpop.f32.mrb[38].mxu1 }
 0x288   : > { %v1505_v44 = vpop.f32.mrb[39].mxu1 }
 0x289   : > { %v1170_v45 = vadd.f32 %v1503_v42, %v2171_v55  ;;  %v1506_v46 = vadd.f32 %v1505_v44, %v1504_v43 }
 0x28b   : > { %1242 = vst [vmem:[%s2174_s28 + $0x90] sm:$0xff] %v1170_v45  ;;  %v1173_v47 = vadd.f32 %v1506_v46, %v2171_v55 }
 0x28d   : > { %1243 = vst [vmem:[%s2174_s28 + $0x98] sm:$0xff] %v1173_v47  ;;  %v1507_v48 = vpop.f32.mrb[40].mxu1 }
 0x28e   : > { %v1508_v49 = vpop.f32.mrb[41].mxu1 }
 0x28f   : > { %v1509_v50 = vadd.f32 %v1508_v49, %v1507_v48  ;;  %v1510_v51 = vpop.f32.mrb[42].mxu1 }
 0x290   : > { %v1511_v52 = vpop.f32.mrb[43].mxu1 }
 0x291   : > { %v1178_v53 = vadd.f32 %v1509_v50, %v2171_v55  ;;  %v1512_v56 = vadd.f32 %v1511_v52, %v1510_v51 }
 0x293   : > { %1244 = vst [vmem:[%s2174_s28 + $0xa0] sm:$0xff] %v1178_v53  ;;  %v1181_v57 = vadd.f32 %v1512_v56, %v2171_v55 }
 0x295   : > { %1245 = vst [vmem:[%s2174_s28 + $0xa8] sm:$0xff] %v1181_v57  ;;  %v1513_v58 = vpop.f32.mrb[44].mxu1 }
 0x296   : > { %v1514_v59 = vpop.f32.mrb[45].mxu1 }
 0x297   : > { %v1515_v60 = vadd.f32 %v1514_v59, %v1513_v58  ;;  %v1516_v61 = vpop.f32.mrb[46].mxu1 }
 0x298   : > { %v1517_v62 = vpop.f32.mrb[47].mxu1 }
 0x299   : > { %v1186_v63 = vadd.f32 %v1515_v60, %v2171_v55  ;;  %v1518_v0 = vadd.f32 %v1517_v62, %v1516_v61 }
 0x29b   : > { %1246 = vst [vmem:[%s2174_s28 + $0xb0] sm:$0xff] %v1186_v63  ;;  %v1189_v1 = vadd.f32 %v1518_v0, %v2171_v55 }
 0x29d   : > { %1247 = vst [vmem:[%s2174_s28 + $0xb8] sm:$0xff] %v1189_v1  ;;  %v1519_v2 = vpop.f32.mrb[48].mxu1 }
 0x29e   : > { %v1520_v3 = vpop.f32.mrb[49].mxu1 }
 0x29f   : > { %v1521_v4 = vadd.f32 %v1520_v3, %v1519_v2  ;;  %v1522_v5 = vpop.f32.mrb[50].mxu1 }
 0x2a0   : > { %v1523_v6 = vpop.f32.mrb[51].mxu1 }
 0x2a1   : > { %v1194_v7 = vadd.f32 %v1521_v4, %v2171_v55  ;;  %v1524_v8 = vadd.f32 %v1523_v6, %v1522_v5 }
 0x2a3   : > { %1248 = vst [vmem:[%s2174_s28 + $0xc0] sm:$0xff] %v1194_v7  ;;  %v1197_v9 = vadd.f32 %v1524_v8, %v2171_v55 }
 0x2a5   : > { %1249 = vst [vmem:[%s2174_s28 + $0xc8] sm:$0xff] %v1197_v9  ;;  %v1525_v10 = vpop.f32.mrb[52].mxu1 }
 0x2a6   : > { %v1526_v11 = vpop.f32.mrb[53].mxu1 }
 0x2a7   : > { %v1527_v12 = vadd.f32 %v1526_v11, %v1525_v10  ;;  %v1528_v13 = vpop.f32.mrb[54].mxu1 }
 0x2a8   : > { %v1529_v14 = vpop.f32.mrb[55].mxu1 }
 0x2a9   : > { %v1202_v15 = vadd.f32 %v1527_v12, %v2171_v55  ;;  %v1530_v16 = vadd.f32 %v1529_v14, %v1528_v13 }
 0x2ab   : > { %1250 = vst [vmem:[%s2174_s28 + $0xd0] sm:$0xff] %v1202_v15  ;;  %v1205_v17 = vadd.f32 %v1530_v16, %v2171_v55 }
 0x2ad   : > { %1251 = vst [vmem:[%s2174_s28 + $0xd8] sm:$0xff] %v1205_v17  ;;  %v1531_v18 = vpop.f32.mrb[56].mxu1 }
 0x2ae   : > { %v1532_v19 = vpop.f32.mrb[57].mxu1 }
 0x2af   : > { %v1533_v20 = vadd.f32 %v1532_v19, %v1531_v18  ;;  %v1534_v21 = vpop.f32.mrb[58].mxu1 }
 0x2b0   : > { %v1535_v22 = vpop.f32.mrb[59].mxu1 }
 0x2b1   : > { %v1210_v23 = vadd.f32 %v1533_v20, %v2171_v55  ;;  %v1536_v24 = vadd.f32 %v1535_v22, %v1534_v21 }
 0x2b3   : > { %1252 = vst [vmem:[%s2174_s28 + $0xe0] sm:$0xff] %v1210_v23  ;;  %v1213_v25 = vadd.f32 %v1536_v24, %v2171_v55 }
 0x2b5   : > { %1253 = vst [vmem:[%s2174_s28 + $0xe8] sm:$0xff] %v1213_v25  ;;  %v1537_v26 = vpop.f32.mrb[60].mxu1 }
 0x2b6   : > { %v1538_v27 = vpop.f32.mrb[61].mxu1 }
 0x2b7   : > { %v1539_v28 = vadd.f32 %v1538_v27, %v1537_v26  ;;  %v1540_v29 = vpop.f32.mrb[62].mxu1 }
 0x2b8   : > { %v1541_v30 = vpop.f32.mrb[63].mxu1 }
 0x2b9   : > { %v1218_v31 = vadd.f32 %v1539_v28, %v2171_v55  ;;  %v1542_v54 = vadd.f32 %v1541_v30, %v1540_v29 }
 0x2bb   : > { %1254 = vst [vmem:[%s2174_s28 + $0xf0] sm:$0xff] %v1218_v31  ;;  %v1221_v32 = vadd.f32 %v1542_v54, %v2171_v55 }
 0x2bd   : > { %1255 = vst [vmem:[%s2174_s28 + $0xf8] sm:$0xff] %v1221_v32 }
 0x2be   : > { %1772 = shalt.err (!%p1769_p2)
}
 0x2bf   : > { %s1773_s24 = scalar_lea.hbm %s2241_s23, 4096  ;;  %s1777_s13 = scalar_lea.hbm %s2295_s5, 8192 }
 0x2c0   : > { %p1774_p13 = scmp.ne.s32.totalorder %s2241_s23, %s1773_s24  ;;  %p1778_p4 = scmp.lt.u32.totalorder %s2241_s23, %s2295_s5 }
 0x2c1   : > { %p1779_p7 = scmp.lt.u32.totalorder %s1777_s13, %s1773_s24  ;;  %p1781_p11 = scmp.lt.u32.totalorder %s1773_s24, %s2241_s23 }
 0x2c2   : > { %p1775_p6 = pnand %p1774_p13, %p2309_p0 }
 0x2c3   : > { %p1780_p8 = por %p1779_p7, %p1778_p4 }
 0x2c4   : > { %p1776_p10 = pneg %p1775_p6 }
 0x2c5   : > { %p1782_p1 = por %p1781_p11, %p1780_p8 }
 0x2c7   : > { %p1783_p3 = pnand %p1782_p1, %p1776_p10 }
 0x2c9   : > { %1786 = shalt.err (!%p1783_p3)
}
 0x2ca   : > { %s1840_s14 = smov 128   ;;  %s1841_s30 = smov 8  }
 0x2cb   : > { %1553 = dma.vmem_to_hbm [thread:$0]  (%p2309_p0), %s2243_s15, 4096, %s2241_s23, %s1257_s22, %s1840_s14, %s1840_s14, %s1841_s30  }
 0x2cc PF: > { %s1285_s11 = sand.u32 1, %s1817_s18   ;;  %p2310_p5 = scmp.ne.s32.totalorder %s2300_s25, 0 }
 0x2cd   : > { %p2311_p9 = scmp.ge.s32.totalorder %s1829_s21, 2  ;;  %s1286_s7 = scalar_lea.sflag [#allocation4], %s1285_s11 }
 0x2cf   : > { %p1567_p12 = pnand %p2311_p9, %p2310_p5 }
 0x2d1   : > { %1812 = dma.done.wait (!%p1567_p12), %s1286_s7, 4096  }
 0x2d2   : > { %1814 = vsyncadd (!%p1567_p12), %s1286_s7, 4294963200  ;;  %p19_p2 = scmp.ge.s32.totalorder %s1985_s16, 4   ;;  %s2312_s18 = smov %s1821_s19 }
 0x2d3   : > { %s2313_s19 = smov %s1825_s20  ;;  %s2314_s20 = smov %s1994_s27 }
 0x2d4   : > { %s2315_s21 = smov %s1985_s16  ;;  %21 = sbr.rel (!%p19_p2) target bundleno = 6 (0x6), region = 93 }
 0x2db   :  { %1291 = vsyncpa [#allocation3], 1 }
 0x2dc   :  { %1293 = vsyncpa [#allocation3 + $0x1], 1 }
 0x2dd   :  { %1294 = vsyncpa [#allocation6], 1 }
 0x2de   :  { %1295 = vsyncpa [#allocation4], 1 }
 0x2df   :  { %1297 = vsyncpa [#allocation4 + $0x1], 1 }

</bundles_post_ra>
